<compile_context>
chip_gen: v5e
topology: v5e:2x2
jax: 0.10.0
libtpu: 0.0.40
codegen_flags: <defaults>
</compile_context>

<pallas_src>
import functools
import math

import numpy as np
import jax
import jax.numpy as jnp
from jax import lax
from jax.experimental import pallas as pl
from jax.experimental.pallas import tpu as pltpu


LANE_WIDTH = 256  # flattened last axis of every tile: 2 full lane-tiles -> unmasked, lane-dense


# ----------------------------- module "__init__" (deterministic params) -----------------------------
def build_const_theta(mic_pos, num_bin, sound_speed=340.0, sample_rate=16000.0):
    num_channel = len(mic_pos)
    nfft = (num_bin - 1) * 2
    const_theta = np.zeros((num_channel, num_channel), dtype=np.float32)
    for i in range(num_channel):
        for j in range(num_channel):
            x1, y1 = mic_pos[i]
            x2, y2 = mic_pos[j]
            dist = math.sqrt((x2 - x1) ** 2 + (y2 - y1) ** 2)
            const_theta[i, j] = 2.0 * math.pi * (sample_rate * dist / sound_speed) / nfft
    return const_theta


# ----------------------------------------- Pallas kernel --------------------------------------------
def make_df_kernel(num_channel, pair_id, row_tile):
    n_chunks = row_tile // 8

    def kernel(x_ref, cosv_ref, sinv_ref, out_ref):
        # Per grid step:
        #   x_ref    (C, 2, row_tile, W)   re/im planes over the flattened (block, frame, bin) axis
        #   cosv_ref (P, row_tile, W)      cos(v)/P, prebroadcast over frames in the wrapper
        #   sinv_ref (P, row_tile, W)      sin(v)/P
        #   out_ref  (row_tile, W)

        def chunk(r0):
            rows = pl.ds(r0, 8)

            # Normalize every channel once: C rsqrt per chunk (EUP slot), no per-pair magnitude
            # work on the hot path.
            re_n, im_n = [], []
            for c in range(num_channel):                    # static -> unrolled
                re = x_ref[c, 0, rows, :]
                im = x_ref[c, 1, rows, :]
                mag2 = re * re + im * im
                nz = mag2 > 0.0
                inv = lax.rsqrt(jnp.where(nz, mag2, 1.0))
                # exactly-zero bins: reference angle = atan2(0, 0) = 0 -> unit phasor (1, 0)
                re_n.append(jnp.where(nz, re * inv, 1.0))
                im_n.append(im * inv)

            # Pair loop: two independent accumulators seeded from the first terms (ILP, no
            # zero-init). 1/num_pair is folded into the tables -> pure mul/add hot loop.
            acc = [None, None]
            for n, (p, q) in enumerate(pair_id):            # static -> unrolled
                cos_pq = re_n[p] * re_n[q] + im_n[p] * im_n[q]
                sin_pq = im_n[p] * re_n[q] - re_n[p] * im_n[q]
                term = cos_pq * cosv_ref[n, rows, :] + sin_pq * sinv_ref[n, rows, :]
                k = n & 1
                acc[k] = term if acc[k] is None else acc[k] + term
            out_ref[rows, :] = acc[0] if acc[1] is None else acc[0] + acc[1]

        if n_chunks == 1:
            chunk(0)
        else:
            # 8-row chunks bound the vreg live set (~30 vregs) while the grid step stays large
            # enough to amortize the ~0.35us per-step overhead.
            @pl.loop(0, n_chunks)
            def _(ci):
                chunk(pl.multiple_of(ci * 8, 8))

    return kernel


# ----------------------------------------- tiling policy --------------------------------------------
def _num_tensorcores_per_chip():
    """Heuristic core count: 2 for megacore-style chips (v7x; v4/v5p), else 1. Perf-only."""
    try:
        kind = jax.devices()[0].device_kind.lower()
    except Exception:
        return 1
    if any(tag in kind for tag in ("v7", "7x", "v4", "v5p")):
        return 2
    return 1


def _pick_row_tile(num_rows, num_planes, lane_width, num_tc):
    """Rows of `lane_width` lanes processed per grid step.

    Budget ~2 MiB of per-step operands (Pallas double-buffers -> ~4 MiB resident), well inside
    v5e's 16 MiB and v7x's 32 MiB default scoped-VMEM limits, and large enough that per-step HBM
    traffic dwarfs the ~0.35us fixed step overhead.  Only on multi-TensorCore chips (v7x) do we
    cap the tile so the grid has >= 2 steps — on single-TC v5e/v6e a split is pure overhead.
    """
    bytes_per_row = num_planes * lane_width * 4
    budget = 2 * 1024 * 1024
    rt = max(8, (budget // max(bytes_per_row, 1)) // 8 * 8)
    if num_tc >= 2 and num_rows > 8:
        half = -(-num_rows // 2)
        rt = min(rt, max(8, -(-half // 8) * 8))
    rows_pad8 = -(-num_rows // 8) * 8
    return min(rt, rows_pad8)


# ------------------------------------------ wrapper -------------------------------------------------
@functools.partial(jax.jit, static_argnames=("pair_id", "num_bin", "num_channel"))
def df_forward(x, tdoas, ct_pairs, *, pair_id, num_bin, num_channel):
    """x: reshapable to [num_block, num_frame, 2, num_bin, num_channel] (re/im on axis 2);
    tdoas: [num_block]; ct_pairs: [num_pair] = const_theta[p, q] for each (p, q) in pair_id."""
    num_block = tdoas.shape[0]
    num_pair = len(pair_id)
    x = x.reshape(num_block, -1, 2, num_bin, num_channel).astype(jnp.float32)
    num_frame = x.shape[1]

    W = LANE_WIDTH
    n_elem = num_block * num_frame * num_bin
    num_rows = -(-n_elem // W)
    num_planes = num_channel * 2 + 2 * num_pair + 1          # x planes + cos/sin tables + output
    row_tile = _pick_row_tile(num_rows, num_planes, W, _num_tensorcores_per_chip())
    rows_pad = -(-num_rows // row_tile) * row_tile
    n_pad = rows_pad * W
    grid = (rows_pad // row_tile,)

    # x -> (C, 2, B*T*F) re/im planes, zero-padded to a whole number of row tiles (zero padding is
    # benign: zero bins contribute 0 and the padded output rows are discarded).
    # TODO(synk): this transpose is an extra HBM round trip unless XLA fuses it into the pallas
    # input DMA (allow_input_fusion below) or the producer emits this layout directly.
    xk = jnp.transpose(x, (4, 2, 0, 1, 3)).reshape(num_channel, 2, n_elem)
    xk = jnp.pad(xk, ((0, 0), (0, 0), (0, n_pad - n_elem)))
    xk = xk.reshape(num_channel, 2, rows_pad, W)

    # Per-(pair, block, bin) phase tables, same op order as the reference
    # (theta = freq * cos(tdoa/180); v = theta * const_theta[p, q]), prebroadcast over frames and
    # flattened in the same (B, T, F) order as x; 1/num_pair folded in.
    freq = (8000.0 / (num_bin - 1)) * jnp.arange(num_bin, dtype=jnp.float32)        # (F,)
    theta = jnp.cos(tdoas.astype(jnp.float32) / 180.0)[:, None] * freq[None, :]     # (B, F)
    v = ct_pairs.astype(jnp.float32)[:, None, None] * theta[None, :, :]             # (P, B, F)
    scale = 1.0 / num_pair
    cosv = jnp.broadcast_to((jnp.cos(v) * scale)[:, :, None, :],
                            (num_pair, num_block, num_frame, num_bin)).reshape(num_pair, n_elem)
    sinv = jnp.broadcast_to((jnp.sin(v) * scale)[:, :, None, :],
                            (num_pair, num_block, num_frame, num_bin)).reshape(num_pair, n_elem)
    cosv = jnp.pad(cosv, ((0, 0), (0, n_pad - n_elem))).reshape(num_pair, rows_pad, W)
    sinv = jnp.pad(sinv, ((0, 0), (0, n_pad - n_elem))).reshape(num_pair, rows_pad, W)

    kernel = make_df_kernel(num_channel, pair_id, row_tile)

    cost = pl.CostEstimate(
        flops=n_pad * (7 * num_channel + 10 * num_pair),
        transcendentals=n_pad * num_channel,                 # one rsqrt per channel-element
        bytes_accessed=num_planes * n_pad * 4,
    )

    out = pl.pallas_call(
        kernel,
        grid=grid,
        in_specs=[
            pl.BlockSpec((num_channel, 2, row_tile, W), lambda i: (0, 0, i, 0)),
            pl.BlockSpec((num_pair, row_tile, W), lambda i: (0, i, 0)),
            pl.BlockSpec((num_pair, row_tile, W), lambda i: (0, i, 0)),
        ],
        out_specs=pl.BlockSpec((row_tile, W), lambda i: (i, 0)),
        out_shape=jax.ShapeDtypeStruct((rows_pad, W), jnp.float32),
        compiler_params=pltpu.CompilerParams(
            dimension_semantics=("parallel",),
            # let XLA fuse the layout-change producer of x into the pallas input DMA when legal
            allow_input_fusion=[True, False, False],
        ),
        cost_estimate=cost,
    )(xk, cosv, sinv)

    return out.reshape(-1)[:n_elem].reshape(num_block, num_frame, num_bin)


# ------------------------------------- pure-JAX reference -------------------------------------------
def df_reference(x, tdoas, pair_id, const_theta, num_bin, num_channel):
    num_block = tdoas.shape[0]
    x = x.reshape(num_block, -1, 2, num_bin, num_channel).astype(jnp.float32)
    num_frame = x.shape[1]
    freq = 8000.0 / (num_bin - 1) * jnp.arange(num_bin, dtype=jnp.float32)
    ang = jnp.arctan2(x[:, :, 1, :, :], x[:, :, 0, :, :])    # [B, T, F, C]
    rows = []
    for b in range(num_block):
        theta = freq * jnp.cos(tdoas[b] / 180.0)
        acc = jnp.zeros((num_frame, num_bin), jnp.float32)
        for (p, q) in pair_id:
            v = (theta * const_theta[p, q]).reshape(1, num_bin)
            acc = acc + jnp.cos(ang[b, :, :, p] - ang[b, :, :, q] - v)
        rows.append(acc / len(pair_id))
    return jnp.stack(rows)


# --------------------------------------------- main -------------------------------------------------
if __name__ == "__main__":
    num_block = 2
    num_frame = 8
    num_bin = 33          # nFFT = 64
    num_channel = 4

    mic_pos = [(0.00, 0.00), (0.03, 0.00), (0.06, 0.00), (0.09, 0.00)]
    pair_id = ((0, 1), (0, 2), (0, 3), (1, 2), (1, 3), (2, 3))
    const_theta = build_const_theta(mic_pos, num_bin)
    ct_pairs = jnp.asarray([const_theta[p, q] for (p, q) in pair_id], dtype=jnp.float32)

    key = jax.random.PRNGKey(0)
    k_x, k_t = jax.random.split(key)
    x = jax.random.normal(k_x, (num_block, num_frame, 2, num_bin, num_channel), dtype=jnp.float32)
    tdoas = jax.random.uniform(k_t, (num_block,), minval=0.0, maxval=180.0, dtype=jnp.float32)

    out = df_forward(x, tdoas, ct_pairs, pair_id=pair_id, num_bin=num_bin, num_channel=num_channel)
    out = jax.block_until_ready(out)

    ref = jax.block_until_ready(df_reference(x, tdoas, pair_id, const_theta, num_bin, num_channel))

    assert out.shape == (num_block, num_frame, num_bin)
    # Tolerance: the phase arguments reach ~3e3 rad (8 kHz * const_theta), where the f32 ulp is
    # ~2.4e-4, so the atan2+cos reference and the phasor-identity kernel can only agree to a few
    # 1e-4 absolute in f32 regardless of implementation (observed max ~1.2e-4); 5e-3 gives margin
    # for hardware transcendental differences while still catching any real formula error.
    np.testing.assert_allclose(np.asarray(out), np.asarray(ref), rtol=5e-3, atol=5e-3)

    print("KERNEL_OK")
</pallas_src>

<mosaic_0001>
module attributes {stable_mosaic.version = 11 : i64} {
  func.func @kernel(%arg0: i32, %arg1: memref<4x2x8x256xf32, #tpu.memory_space<vmem>>, %arg2: memref<6x8x256xf32, #tpu.memory_space<vmem>>, %arg3: memref<6x8x256xf32, #tpu.memory_space<vmem>>, %arg4: memref<8x256xf32, #tpu.memory_space<vmem>>) attributes {dimension_semantics = [#tpu.dimension_semantics<parallel>], iteration_bounds = array<i64: 1>, scalar_prefetch = 0 : i64, scratch_operands = 0 : i64, tpu.core_type = #tpu.core_type<tc>, window_params = [{transform_indices = @transform_0, window_bounds = array<i64: 4, 2, 8, 256>}, {transform_indices = @transform_1, window_bounds = array<i64: 6, 8, 256>}, {transform_indices = @transform_2, window_bounds = array<i64: 6, 8, 256>}, {transform_indices = @transform_3, window_bounds = array<i64: 8, 256>}]} {
    %c0 = arith.constant 0 : index
    %c0_0 = arith.constant 0 : index
    %c0_1 = arith.constant 0 : index
    %c0_2 = arith.constant 0 : index
    %0 = vector.load %arg1[%c0, %c0_0, %c0_1, %c0_2] : memref<4x2x8x256xf32, #tpu.memory_space<vmem>>, vector<1x1x8x256xf32>
    %1 = vector.shape_cast %0 : vector<1x1x8x256xf32> to vector<8x256xf32>
    %c0_3 = arith.constant 0 : index
    %c1 = arith.constant 1 : index
    %c0_4 = arith.constant 0 : index
    %c0_5 = arith.constant 0 : index
    %2 = vector.load %arg1[%c0_3, %c1, %c0_4, %c0_5] : memref<4x2x8x256xf32, #tpu.memory_space<vmem>>, vector<1x1x8x256xf32>
    %3 = vector.shape_cast %2 : vector<1x1x8x256xf32> to vector<8x256xf32>
    %4 = arith.mulf %1, %1 : vector<8x256xf32>
    %5 = arith.mulf %3, %3 : vector<8x256xf32>
    %6 = arith.addf %4, %5 : vector<8x256xf32>
    %cst = arith.constant 0.000000e+00 : f32
    %7 = vector.broadcast %cst : f32 to vector<8x256xf32>
    %8 = arith.cmpf ogt, %6, %7 : vector<8x256xf32>
    %cst_6 = arith.constant 1.000000e+00 : f32
    %9 = vector.broadcast %cst_6 : f32 to vector<8x256xf32>
    %10 = arith.select %8, %6, %9 : vector<8x256xi1>, vector<8x256xf32>
    %11 = math.rsqrt %10 : vector<8x256xf32>
    %12 = arith.mulf %1, %11 : vector<8x256xf32>
    %cst_7 = arith.constant 1.000000e+00 : f32
    %13 = vector.broadcast %cst_7 : f32 to vector<8x256xf32>
    %14 = arith.select %8, %12, %13 : vector<8x256xi1>, vector<8x256xf32>
    %15 = arith.mulf %3, %11 : vector<8x256xf32>
    %c1_8 = arith.constant 1 : index
    %c0_9 = arith.constant 0 : index
    %c0_10 = arith.constant 0 : index
    %c0_11 = arith.constant 0 : index
    %16 = vector.load %arg1[%c1_8, %c0_9, %c0_10, %c0_11] : memref<4x2x8x256xf32, #tpu.memory_space<vmem>>, vector<1x1x8x256xf32>
    %17 = vector.shape_cast %16 : vector<1x1x8x256xf32> to vector<8x256xf32>
    %c1_12 = arith.constant 1 : index
    %c1_13 = arith.constant 1 : index
    %c0_14 = arith.constant 0 : index
    %c0_15 = arith.constant 0 : index
    %18 = vector.load %arg1[%c1_12, %c1_13, %c0_14, %c0_15] : memref<4x2x8x256xf32, #tpu.memory_space<vmem>>, vector<1x1x8x256xf32>
    %19 = vector.shape_cast %18 : vector<1x1x8x256xf32> to vector<8x256xf32>
    %20 = arith.mulf %17, %17 : vector<8x256xf32>
    %21 = arith.mulf %19, %19 : vector<8x256xf32>
    %22 = arith.addf %20, %21 : vector<8x256xf32>
    %cst_16 = arith.constant 0.000000e+00 : f32
    %23 = vector.broadcast %cst_16 : f32 to vector<8x256xf32>
    %24 = arith.cmpf ogt, %22, %23 : vector<8x256xf32>
    %cst_17 = arith.constant 1.000000e+00 : f32
    %25 = vector.broadcast %cst_17 : f32 to vector<8x256xf32>
    %26 = arith.select %24, %22, %25 : vector<8x256xi1>, vector<8x256xf32>
    %27 = math.rsqrt %26 : vector<8x256xf32>
    %28 = arith.mulf %17, %27 : vector<8x256xf32>
    %cst_18 = arith.constant 1.000000e+00 : f32
    %29 = vector.broadcast %cst_18 : f32 to vector<8x256xf32>
    %30 = arith.select %24, %28, %29 : vector<8x256xi1>, vector<8x256xf32>
    %31 = arith.mulf %19, %27 : vector<8x256xf32>
    %c2 = arith.constant 2 : index
    %c0_19 = arith.constant 0 : index
    %c0_20 = arith.constant 0 : index
    %c0_21 = arith.constant 0 : index
    %32 = vector.load %arg1[%c2, %c0_19, %c0_20, %c0_21] : memref<4x2x8x256xf32, #tpu.memory_space<vmem>>, vector<1x1x8x256xf32>
    %33 = vector.shape_cast %32 : vector<1x1x8x256xf32> to vector<8x256xf32>
    %c2_22 = arith.constant 2 : index
    %c1_23 = arith.constant 1 : index
    %c0_24 = arith.constant 0 : index
    %c0_25 = arith.constant 0 : index
    %34 = vector.load %arg1[%c2_22, %c1_23, %c0_24, %c0_25] : memref<4x2x8x256xf32, #tpu.memory_space<vmem>>, vector<1x1x8x256xf32>
    %35 = vector.shape_cast %34 : vector<1x1x8x256xf32> to vector<8x256xf32>
    %36 = arith.mulf %33, %33 : vector<8x256xf32>
    %37 = arith.mulf %35, %35 : vector<8x256xf32>
    %38 = arith.addf %36, %37 : vector<8x256xf32>
    %cst_26 = arith.constant 0.000000e+00 : f32
    %39 = vector.broadcast %cst_26 : f32 to vector<8x256xf32>
    %40 = arith.cmpf ogt, %38, %39 : vector<8x256xf32>
    %cst_27 = arith.constant 1.000000e+00 : f32
    %41 = vector.broadcast %cst_27 : f32 to vector<8x256xf32>
    %42 = arith.select %40, %38, %41 : vector<8x256xi1>, vector<8x256xf32>
    %43 = math.rsqrt %42 : vector<8x256xf32>
    %44 = arith.mulf %33, %43 : vector<8x256xf32>
    %cst_28 = arith.constant 1.000000e+00 : f32
    %45 = vector.broadcast %cst_28 : f32 to vector<8x256xf32>
    %46 = arith.select %40, %44, %45 : vector<8x256xi1>, vector<8x256xf32>
    %47 = arith.mulf %35, %43 : vector<8x256xf32>
    %c3 = arith.constant 3 : index
    %c0_29 = arith.constant 0 : index
    %c0_30 = arith.constant 0 : index
    %c0_31 = arith.constant 0 : index
    %48 = vector.load %arg1[%c3, %c0_29, %c0_30, %c0_31] : memref<4x2x8x256xf32, #tpu.memory_space<vmem>>, vector<1x1x8x256xf32>
    %49 = vector.shape_cast %48 : vector<1x1x8x256xf32> to vector<8x256xf32>
    %c3_32 = arith.constant 3 : index
    %c1_33 = arith.constant 1 : index
    %c0_34 = arith.constant 0 : index
    %c0_35 = arith.constant 0 : index
    %50 = vector.load %arg1[%c3_32, %c1_33, %c0_34, %c0_35] : memref<4x2x8x256xf32, #tpu.memory_space<vmem>>, vector<1x1x8x256xf32>
    %51 = vector.shape_cast %50 : vector<1x1x8x256xf32> to vector<8x256xf32>
    %52 = arith.mulf %49, %49 : vector<8x256xf32>
    %53 = arith.mulf %51, %51 : vector<8x256xf32>
    %54 = arith.addf %52, %53 : vector<8x256xf32>
    %cst_36 = arith.constant 0.000000e+00 : f32
    %55 = vector.broadcast %cst_36 : f32 to vector<8x256xf32>
    %56 = arith.cmpf ogt, %54, %55 : vector<8x256xf32>
    %cst_37 = arith.constant 1.000000e+00 : f32
    %57 = vector.broadcast %cst_37 : f32 to vector<8x256xf32>
    %58 = arith.select %56, %54, %57 : vector<8x256xi1>, vector<8x256xf32>
    %59 = math.rsqrt %58 : vector<8x256xf32>
    %60 = arith.mulf %49, %59 : vector<8x256xf32>
    %cst_38 = arith.constant 1.000000e+00 : f32
    %61 = vector.broadcast %cst_38 : f32 to vector<8x256xf32>
    %62 = arith.select %56, %60, %61 : vector<8x256xi1>, vector<8x256xf32>
    %63 = arith.mulf %51, %59 : vector<8x256xf32>
    %64 = arith.mulf %14, %30 : vector<8x256xf32>
    %65 = arith.mulf %15, %31 : vector<8x256xf32>
    %66 = arith.addf %64, %65 : vector<8x256xf32>
    %67 = arith.mulf %15, %30 : vector<8x256xf32>
    %68 = arith.mulf %14, %31 : vector<8x256xf32>
    %69 = arith.subf %67, %68 : vector<8x256xf32>
    %c0_39 = arith.constant 0 : index
    %c0_40 = arith.constant 0 : index
    %c0_41 = arith.constant 0 : index
    %70 = vector.load %arg2[%c0_39, %c0_40, %c0_41] : memref<6x8x256xf32, #tpu.memory_space<vmem>>, vector<1x8x256xf32>
    %71 = vector.shape_cast %70 : vector<1x8x256xf32> to vector<8x256xf32>
    %72 = arith.mulf %66, %71 : vector<8x256xf32>
    %c0_42 = arith.constant 0 : index
    %c0_43 = arith.constant 0 : index
    %c0_44 = arith.constant 0 : index
    %73 = vector.load %arg3[%c0_42, %c0_43, %c0_44] : memref<6x8x256xf32, #tpu.memory_space<vmem>>, vector<1x8x256xf32>
    %74 = vector.shape_cast %73 : vector<1x8x256xf32> to vector<8x256xf32>
    %75 = arith.mulf %69, %74 : vector<8x256xf32>
    %76 = arith.addf %72, %75 : vector<8x256xf32>
    %77 = arith.mulf %14, %46 : vector<8x256xf32>
    %78 = arith.mulf %15, %47 : vector<8x256xf32>
    %79 = arith.addf %77, %78 : vector<8x256xf32>
    %80 = arith.mulf %15, %46 : vector<8x256xf32>
    %81 = arith.mulf %14, %47 : vector<8x256xf32>
    %82 = arith.subf %80, %81 : vector<8x256xf32>
    %c1_45 = arith.constant 1 : index
    %c0_46 = arith.constant 0 : index
    %c0_47 = arith.constant 0 : index
    %83 = vector.load %arg2[%c1_45, %c0_46, %c0_47] : memref<6x8x256xf32, #tpu.memory_space<vmem>>, vector<1x8x256xf32>
    %84 = vector.shape_cast %83 : vector<1x8x256xf32> to vector<8x256xf32>
    %85 = arith.mulf %79, %84 : vector<8x256xf32>
    %c1_48 = arith.constant 1 : index
    %c0_49 = arith.constant 0 : index
    %c0_50 = arith.constant 0 : index
    %86 = vector.load %arg3[%c1_48, %c0_49, %c0_50] : memref<6x8x256xf32, #tpu.memory_space<vmem>>, vector<1x8x256xf32>
    %87 = vector.shape_cast %86 : vector<1x8x256xf32> to vector<8x256xf32>
    %88 = arith.mulf %82, %87 : vector<8x256xf32>
    %89 = arith.addf %85, %88 : vector<8x256xf32>
    %90 = arith.mulf %14, %62 : vector<8x256xf32>
    %91 = arith.mulf %15, %63 : vector<8x256xf32>
    %92 = arith.addf %90, %91 : vector<8x256xf32>
    %93 = arith.mulf %15, %62 : vector<8x256xf32>
    %94 = arith.mulf %14, %63 : vector<8x256xf32>
    %95 = arith.subf %93, %94 : vector<8x256xf32>
    %c2_51 = arith.constant 2 : index
    %c0_52 = arith.constant 0 : index
    %c0_53 = arith.constant 0 : index
    %96 = vector.load %arg2[%c2_51, %c0_52, %c0_53] : memref<6x8x256xf32, #tpu.memory_space<vmem>>, vector<1x8x256xf32>
    %97 = vector.shape_cast %96 : vector<1x8x256xf32> to vector<8x256xf32>
    %98 = arith.mulf %92, %97 : vector<8x256xf32>
    %c2_54 = arith.constant 2 : index
    %c0_55 = arith.constant 0 : index
    %c0_56 = arith.constant 0 : index
    %99 = vector.load %arg3[%c2_54, %c0_55, %c0_56] : memref<6x8x256xf32, #tpu.memory_space<vmem>>, vector<1x8x256xf32>
    %100 = vector.shape_cast %99 : vector<1x8x256xf32> to vector<8x256xf32>
    %101 = arith.mulf %95, %100 : vector<8x256xf32>
    %102 = arith.addf %98, %101 : vector<8x256xf32>
    %103 = arith.addf %76, %102 : vector<8x256xf32>
    %104 = arith.mulf %30, %46 : vector<8x256xf32>
    %105 = arith.mulf %31, %47 : vector<8x256xf32>
    %106 = arith.addf %104, %105 : vector<8x256xf32>
    %107 = arith.mulf %31, %46 : vector<8x256xf32>
    %108 = arith.mulf %30, %47 : vector<8x256xf32>
    %109 = arith.subf %107, %108 : vector<8x256xf32>
    %c3_57 = arith.constant 3 : index
    %c0_58 = arith.constant 0 : index
    %c0_59 = arith.constant 0 : index
    %110 = vector.load %arg2[%c3_57, %c0_58, %c0_59] : memref<6x8x256xf32, #tpu.memory_space<vmem>>, vector<1x8x256xf32>
    %111 = vector.shape_cast %110 : vector<1x8x256xf32> to vector<8x256xf32>
    %112 = arith.mulf %106, %111 : vector<8x256xf32>
    %c3_60 = arith.constant 3 : index
    %c0_61 = arith.constant 0 : index
    %c0_62 = arith.constant 0 : index
    %113 = vector.load %arg3[%c3_60, %c0_61, %c0_62] : memref<6x8x256xf32, #tpu.memory_space<vmem>>, vector<1x8x256xf32>
    %114 = vector.shape_cast %113 : vector<1x8x256xf32> to vector<8x256xf32>
    %115 = arith.mulf %109, %114 : vector<8x256xf32>
    %116 = arith.addf %112, %115 : vector<8x256xf32>
    %117 = arith.addf %89, %116 : vector<8x256xf32>
    %118 = arith.mulf %30, %62 : vector<8x256xf32>
    %119 = arith.mulf %31, %63 : vector<8x256xf32>
    %120 = arith.addf %118, %119 : vector<8x256xf32>
    %121 = arith.mulf %31, %62 : vector<8x256xf32>
    %122 = arith.mulf %30, %63 : vector<8x256xf32>
    %123 = arith.subf %121, %122 : vector<8x256xf32>
    %c4 = arith.constant 4 : index
    %c0_63 = arith.constant 0 : index
    %c0_64 = arith.constant 0 : index
    %124 = vector.load %arg2[%c4, %c0_63, %c0_64] : memref<6x8x256xf32, #tpu.memory_space<vmem>>, vector<1x8x256xf32>
    %125 = vector.shape_cast %124 : vector<1x8x256xf32> to vector<8x256xf32>
    %126 = arith.mulf %120, %125 : vector<8x256xf32>
    %c4_65 = arith.constant 4 : index
    %c0_66 = arith.constant 0 : index
    %c0_67 = arith.constant 0 : index
    %127 = vector.load %arg3[%c4_65, %c0_66, %c0_67] : memref<6x8x256xf32, #tpu.memory_space<vmem>>, vector<1x8x256xf32>
    %128 = vector.shape_cast %127 : vector<1x8x256xf32> to vector<8x256xf32>
    %129 = arith.mulf %123, %128 : vector<8x256xf32>
    %130 = arith.addf %126, %129 : vector<8x256xf32>
    %131 = arith.addf %103, %130 : vector<8x256xf32>
    %132 = arith.mulf %46, %62 : vector<8x256xf32>
    %133 = arith.mulf %47, %63 : vector<8x256xf32>
    %134 = arith.addf %132, %133 : vector<8x256xf32>
    %135 = arith.mulf %47, %62 : vector<8x256xf32>
    %136 = arith.mulf %46, %63 : vector<8x256xf32>
    %137 = arith.subf %135, %136 : vector<8x256xf32>
    %c5 = arith.constant 5 : index
    %c0_68 = arith.constant 0 : index
    %c0_69 = arith.constant 0 : index
    %138 = vector.load %arg2[%c5, %c0_68, %c0_69] : memref<6x8x256xf32, #tpu.memory_space<vmem>>, vector<1x8x256xf32>
    %139 = vector.shape_cast %138 : vector<1x8x256xf32> to vector<8x256xf32>
    %140 = arith.mulf %134, %139 : vector<8x256xf32>
    %c5_70 = arith.constant 5 : index
    %c0_71 = arith.constant 0 : index
    %c0_72 = arith.constant 0 : index
    %141 = vector.load %arg3[%c5_70, %c0_71, %c0_72] : memref<6x8x256xf32, #tpu.memory_space<vmem>>, vector<1x8x256xf32>
    %142 = vector.shape_cast %141 : vector<1x8x256xf32> to vector<8x256xf32>
    %143 = arith.mulf %137, %142 : vector<8x256xf32>
    %144 = arith.addf %140, %143 : vector<8x256xf32>
    %145 = arith.addf %117, %144 : vector<8x256xf32>
    %146 = arith.addf %131, %145 : vector<8x256xf32>
    %c0_73 = arith.constant 0 : index
    %c0_74 = arith.constant 0 : index
    %147 = vector.load %arg4[%c0_73, %c0_74] : memref<8x256xf32, #tpu.memory_space<vmem>>, vector<8x256xf32>
    tpu.vector_store %arg4[%c0_73, %c0_74], %146 {strides = array<i32>} : memref<8x256xf32, #tpu.memory_space<vmem>>, vector<8x256xf32>,
    return
  }
  func.func @transform_0(%arg0: i32) -> (i32, i32, i32, i32) {
    %c0_i32 = arith.constant 0 : i32
    %c0_i32_0 = arith.constant 0 : i32
    %c0_i32_1 = arith.constant 0 : i32
    %c0_i32_2 = arith.constant 0 : i32
    return %c0_i32, %c0_i32_0, %arg0, %c0_i32_1 : i32, i32, i32, i32
  }
  func.func @transform_1(%arg0: i32) -> (i32, i32, i32) {
    %c0_i32 = arith.constant 0 : i32
    %c0_i32_0 = arith.constant 0 : i32
    %c0_i32_1 = arith.constant 0 : i32
    return %c0_i32, %arg0, %c0_i32_0 : i32, i32, i32
  }
  func.func @transform_2(%arg0: i32) -> (i32, i32, i32) {
    %c0_i32 = arith.constant 0 : i32
    %c0_i32_0 = arith.constant 0 : i32
    %c0_i32_1 = arith.constant 0 : i32
    return %c0_i32, %arg0, %c0_i32_0 : i32, i32, i32
  }
  func.func @transform_3(%arg0: i32) -> (i32, i32) {
    %c0_i32 = arith.constant 0 : i32
    %c0_i32_0 = arith.constant 0 : i32
    return %arg0, %c0_i32 : i32, i32
  }
}

</mosaic_0001>

<bundles_post_ra>
// kernel: df_forward.1
= control target key start
LH: loop header
LB: loop body
LE: loop exit
PB: predicated region body
PF: predicated region fallthrough
CT: control target
= control target key end

     0   :  { %s879_s0 = inlined_call_operand.vmem [shape: f32[4,2,8,256], index: 0, kind: input, shape index: {}]   ;;  %s880_s1 = inlined_call_operand.vmem [shape: f32[6,8,256], index: 1, kind: input, shape index: {}]   ;;  %s881_s2 = inlined_call_operand.vmem [shape: f32[6,8,256], index: 2, kind: input, shape index: {}]   ;;  %s882_s3 = inlined_call_operand.vmem [shape: f32[8,256], index: 3, kind: output, shape index: {}]  }
   0x1   :  { %v412_v0 = vld [vmem:[%s879_s0] sm:$0xff]  ;;  %v417_v1 = vld [vmem:[%s879_s0 + $0x8] sm:$0xff]  ;;  %v422_v2 = vld [vmem:[%s879_s0 + $0x10] sm:$0xff] }
   0x2   :  { %v427_v3 = vld [vmem:[%s879_s0 + $0x18] sm:$0xff]  ;;  %v19_v4 = vmul.f32 %v412_v0, %v412_v0  ;;  %v20_v5 = vmul.f32 %v417_v1, %v417_v1  ;;  %v21_v6 = vmul.f32 %v422_v2, %v422_v2  ;;  %v438_v7 = vld [vmem:[%s879_s0 + $0x20] sm:$0xff]  ;;  %v443_v8 = vld [vmem:[%s879_s0 + $0x28] sm:$0xff] }
   0x3   :  { %v22_v9 = vmul.f32 %v427_v3, %v427_v3  ;;  %v450_v10 = vld [vmem:[%s879_s0 + $0x30] sm:$0xff]  ;;  %v455_v11 = vld [vmem:[%s879_s0 + $0x38] sm:$0xff]  ;;  %v61_v12 = vmul.f32 %v438_v7, %v438_v7  ;;  %v62_v13 = vmul.f32 %v443_v8, %v443_v8  ;;  %v464_v14 = vld [vmem:[%s879_s0 + $0x40] sm:$0xff] }
   0x4   :  { %v466_v15 = vadd.f32 %v21_v6, %v19_v4  ;;  %v63_v16 = vmul.f32 %v450_v10, %v450_v10  ;;  %v64_v17 = vmul.f32 %v455_v11, %v455_v11  ;;  %v475_v18 = vld [vmem:[%s879_s0 + $0x48] sm:$0xff]  ;;  %v480_v19 = vld [vmem:[%s879_s0 + $0x50] sm:$0xff]  ;;  %v485_v20 = vld [vmem:[%s879_s0 + $0x58] sm:$0xff]  ;;  %v103_v21 = vmul.f32 %v464_v14, %v464_v14 }
   0x5   :  { %v489_v22 = vadd.f32 %v22_v9, %v20_v5  ;;  %v104_v23 = vmul.f32 %v475_v18, %v475_v18  ;;  %v105_v24 = vmul.f32 %v480_v19, %v480_v19  ;;  %v106_v25 = vmul.f32 %v485_v20, %v485_v20  ;;  %v519_v32 = vld [vmem:[%s879_s0 + $0x60] sm:$0xff]  ;;  %v531_v34 = vld [vmem:[%s879_s0 + $0x68] sm:$0xff]  ;;  %v543_v36 = vld [vmem:[%s879_s0 + $0x70] sm:$0xff] }
   0x6   :  { %vm25_vm0 = vcmp.gt.f32.partialorder %v466_v15, 0.0  ;;  %v498_v26 = vadd.f32 %v63_v16, %v61_v12  ;;  %v500_v27 = vadd.f32 %v64_v17, %v62_v13  ;;  %v548_v37 = vld [vmem:[%s879_s0 + $0x78] sm:$0xff]  ;;  %v145_v39 = vmul.f32 %v519_v32, %v519_v32 }
   0x7   :  { %vm26_vm1 = vcmp.gt.f32.partialorder %v489_v22, 0.0  ;;  %v27_v28 = vsel %vm25_vm0, %v466_v15, 1.0  ;;  %v506_v29 = vadd.f32 %v105_v24, %v103_v21  ;;  %v508_v30 = vadd.f32 %v106_v25, %v104_v23 }
   0x8   :  { %v513_v31 = vsel %vm26_vm1, %v489_v22, 1.0  ;;  %373 = vrsqrt.f32 %v27_v28  ;;  %vm886_vm2 = vcmp.gt.f32.partialorder %v498_v26, 0.0  ;;  %vm885_vm3 = vcmp.gt.f32.partialorder %v500_v27, 0.0 }
   0x9   :  { %375 = vrsqrt.f32 %v513_v31  ;;  %v526_v33 = vsel %vm886_vm2, %v498_v26, 1.0  ;;  %v536_v35 = vsel %vm885_vm3, %v500_v27, 1.0  ;;  %vm884_vm4 = vcmp.gt.f32.partialorder %v506_v29, 0.0 }
   0xa   :  { %377 = vrsqrt.f32 %v526_v33  ;;  %vm883_vm5 = vcmp.gt.f32.partialorder %v508_v30, 0.0  ;;  %v555_v38 = vsel %vm884_vm4, %v506_v29, 1.0  ;;  %v146_v41 = vmul.f32 %v531_v34, %v531_v34 }
   0xb   :  { %379 = vrsqrt.f32 %v536_v35  ;;  %v562_v40 = vsel %vm883_vm5, %v508_v30, 1.0  ;;  %v147_v42 = vmul.f32 %v543_v36, %v543_v36  ;;  %v148_v43 = vmul.f32 %v548_v37, %v548_v37 }
   0xc   :  { %381 = vrsqrt.f32 %v555_v38  ;;  %vm35_vm6 = vweird.f32 %v27_v28  ;;  %vm45_vm7 = vweird.f32 %v513_v31  ;;  %vm77_vm8 = vweird.f32 %v526_v33 }
   0xd   :  { %383 = vrsqrt.f32 %v562_v40  ;;  %v574_v47 = vadd.f32 %v147_v42, %v145_v39  ;;  %v576_v48 = vadd.f32 %v148_v43, %v146_v41  ;;  %vm87_vm10 = vweird.f32 %v536_v35 }
   0xe   :  { %v374_v44 = vpop.eup %373  ;;  %vm119_vm11 = vweird.f32 %v555_v38 }
   0xf   :  { %v376_v45 = vpop.eup %375  ;;  %v30_v46 = vmul.f32 %v374_v44, %v27_v28  ;;  %vm36_vm9 = vweird.f32 %v374_v44  ;;  %vm151_vm15 = vcmp.gt.f32.partialorder %v574_v47, 0.0  ;;  %vm887_vm5 = vcmp.gt.f32.partialorder %v576_v48, 0.0 }
  0x10   :  { %v378_v49 = vpop.eup %377  ;;  %v40_v50 = vmul.f32 %v376_v45, %v513_v31  ;;  %vm46_vm12 = vweird.f32 %v376_v45  ;;  %v593_v9 = vsel %vm151_vm15, %v574_v47, 1.0  ;;  %vm37_vm3 = vmor %vm35_vm6, %vm36_vm9  ;;  %v601_v17 = vsel %vm887_vm5, %v576_v48, 1.0 }
  0x11   :  { %v380_v51 = vpop.eup %379  ;;  %v31_v52 = vmul.f32 %v374_v44, %v30_v46  ;;  %v72_v53 = vmul.f32 %v378_v49, %v526_v33  ;;  %vm78_vm13 = vweird.f32 %v378_v49  ;;  %vm47_vm2 = vmor %vm45_vm7, %vm46_vm12  ;;  %385 = vrsqrt.f32 %v593_v9 }
  0x12   :  { %v382_v54 = vpop.eup %381  ;;  %v41_v55 = vmul.f32 %v376_v45, %v40_v50  ;;  %v82_v56 = vmul.f32 %v380_v51, %v536_v35  ;;  %vm88_vm14 = vweird.f32 %v380_v51  ;;  %vm79_vm6 = vmor %vm77_vm8, %vm78_vm13  ;;  %vm129_vm9 = vweird.f32 %v562_v40 }
  0x13   :  { %v584_v57 = vpop.eup %383  ;;  %v32_v58 = vmul.f32 0.5, %v31_v52  ;;  %v73_v59 = vmul.f32 %v378_v49, %v72_v53  ;;  %v114_v60 = vmul.f32 %v382_v54, %v555_v38  ;;  %vm120_vm4 = vweird.f32 %v382_v54  ;;  %vm89_vm7 = vmor %vm87_vm10, %vm88_vm14 }
  0x14   :  { %v42_v61 = vmul.f32 0.5, %v41_v55  ;;  %v83_v62 = vmul.f32 %v380_v51, %v82_v56  ;;  %v124_v63 = vmul.f32 %v584_v57, %v562_v40  ;;  %vm130_vm5 = vweird.f32 %v584_v57  ;;  %vm121_vm8 = vmor %vm119_vm11, %vm120_vm4 }
  0x15   :  { %v33_v4 = vsub.f32 1.5, %v32_v58  ;;  %v74_v5 = vmul.f32 0.5, %v73_v59  ;;  %v115_v6 = vmul.f32 %v382_v54, %v114_v60  ;;  %387 = vrsqrt.f32 %v601_v17  ;;  %vm131_vm4 = vmor %vm129_vm9, %vm130_vm5 }
  0x16   :  { %v43_v12 = vsub.f32 1.5, %v42_v61  ;;  %v84_v13 = vmul.f32 0.5, %v83_v62  ;;  %v125_v16 = vmul.f32 %v584_v57, %v124_v63  ;;  %vm171_vm10 = vweird.f32 %v601_v17 }
  0x17   :  { %v34_v21 = vmul.f32 %v374_v44, %v33_v4  ;;  %v75_v23 = vsub.f32 1.5, %v74_v5  ;;  %v116_v24 = vmul.f32 0.5, %v115_v6  ;;  %v386_v55 = vpop.eup %385  ;;  %vm890_vm11 = vcmp.gt.f32.partialorder %v506_v29, 0.0 }
  0x18   :  { %v44_v25 = vmul.f32 %v376_v45, %v43_v12  ;;  %v85_v28 = vsub.f32 1.5, %v84_v13  ;;  %v126_v33 = vmul.f32 0.5, %v125_v16  ;;  %v193_v13 = vld [vmem:[%s880_s1] sm:$0xff]  ;;  %vm891_vm12 = vcmp.gt.f32.partialorder %v508_v30, 0.0 }
  0x19   :  { %v38_v39 = vsel %vm37_vm3, %v374_v44, %v34_v21  ;;  %v76_v41 = vmul.f32 %v378_v49, %v75_v23  ;;  %v117_v31 = vsub.f32 1.5, %v116_v24  ;;  %vm161_vm3 = vweird.f32 %v593_v9  ;;  %v194_v24 = vld [vmem:[%s880_s1 + $0x8] sm:$0xff]  ;;  %v197_v30 = vld [vmem:[%s881_s2] sm:$0xff] }
  0x1a   :  { %v48_v42 = vsel %vm47_vm2, %v376_v45, %v44_v25  ;;  %v49_v43 = vmul.f32 %v38_v39, %v412_v0  ;;  %v86_v46 = vmul.f32 %v380_v51, %v85_v28  ;;  %v623_v35 = vmul.f32 %v422_v2, %v38_v39 }
  0x1b   :  { %v50_v50 = vmul.f32 %v48_v42, %v417_v1  ;;  %v80_v44 = vsel %vm79_vm6, %v378_v49, %v76_v41  ;;  %v118_v52 = vmul.f32 %v382_v54, %v117_v31  ;;  %v626_v53 = vmul.f32 %v427_v3, %v48_v42 }
  0x1c   :  { %v90_v45 = vsel %vm89_vm7, %v380_v51, %v86_v46  ;;  %v91_v0 = vmul.f32 %v438_v7, %v80_v44  ;;  %v631_v38 = vsel %vm25_vm0, %v49_v43, 1.0  ;;  %v635_v49 = vmul.f32 %v450_v10, %v80_v44  ;;  %v388_v51 = vpop.eup %387 }
  0x1d   :  { %v92_v1 = vmul.f32 %v443_v8, %v90_v45  ;;  %v122_v56 = vsel %vm121_vm8, %v382_v54, %v118_v52  ;;  %v639_v2 = vsel %vm26_vm1, %v50_v50, 1.0  ;;  %vm888_vm2 = vcmp.gt.f32.partialorder %v498_v26, 0.0 }
  0x1e   :  { %v643_v3 = vsel %vm888_vm2, %v91_v0, 1.0  ;;  %v646_v7 = vmul.f32 %v455_v11, %v90_v45  ;;  %v127_v15 = vsub.f32 1.5, %v126_v33  ;;  %vm889_vm0 = vcmp.gt.f32.partialorder %v500_v27, 0.0 }
  0x1f   :  { %v650_v8 = vsel %vm889_vm0, %v92_v1, 1.0  ;;  %v133_v10 = vmul.f32 %v464_v14, %v122_v56  ;;  %v658_v22 = vmul.f32 %v480_v19, %v122_v56  ;;  %v156_v26 = vmul.f32 %v386_v55, %v593_v9  ;;  %v198_v9 = vld [vmem:[%s881_s2 + $0x8] sm:$0xff] }
  0x20   :  { %v128_v11 = vmul.f32 %v584_v57, %v127_v15  ;;  %vm162_vm1 = vweird.f32 %v386_v55  ;;  %v166_v54 = vmul.f32 %v388_v51, %v601_v17  ;;  %v181_v58 = vmul.f32 %v643_v3, %v631_v38 }
  0x21   :  { %v157_v27 = vmul.f32 %v386_v55, %v156_v26  ;;  %v182_v40 = vmul.f32 %v650_v8, %v639_v2  ;;  %v183_v14 = vmul.f32 %v635_v49, %v623_v35  ;;  %vm172_vm5 = vweird.f32 %v388_v51  ;;  %vm163_vm13 = vmor %vm161_vm3, %vm162_vm1 }
  0x22   :  { %v132_v19 = vsel %vm131_vm4, %v584_v57, %v128_v11  ;;  %v167_v59 = vmul.f32 %v388_v51, %v166_v54  ;;  %v184_v60 = vmul.f32 %v646_v7, %v626_v53  ;;  %v187_v4 = vmul.f32 %v643_v3, %v623_v35  ;;  %vm173_vm14 = vmor %vm171_vm10, %vm172_vm5 }
  0x23   :  { %v134_v61 = vmul.f32 %v475_v18, %v132_v19  ;;  %v158_v62 = vmul.f32 0.5, %v157_v27  ;;  %v185_v63 = vadd.f32 %v183_v14, %v181_v58  ;;  %v188_v12 = vmul.f32 %v650_v8, %v626_v53  ;;  %v353_v58 = vld [vmem:[%s880_s1 + $0x10] sm:$0xff]  ;;  %v354_v14 = vld [vmem:[%s880_s1 + $0x18] sm:$0xff] }
  0x24   :  { %v168_v5 = vmul.f32 0.5, %v167_v59  ;;  %v186_v6 = vadd.f32 %v184_v60, %v182_v40  ;;  %v189_v57 = vmul.f32 %v635_v49, %v631_v38  ;;  %v685_v18 = vsel %vm890_vm11, %v133_v10, 1.0  ;;  %v356_v59 = vld [vmem:[%s881_s2 + $0x18] sm:$0xff] }
  0x25   :  { %v688_v16 = vmul.f32 %v485_v20, %v132_v19  ;;  %v159_v21 = vsub.f32 1.5, %v158_v62  ;;  %v190_v23 = vmul.f32 %v646_v7, %v639_v2  ;;  %v697_v25 = vsel %vm891_vm12, %v134_v61, 1.0  ;;  %v355_v19 = vld [vmem:[%s881_s2 + $0x10] sm:$0xff] }
  0x26   :  { %v169_v29 = vsub.f32 1.5, %v168_v5  ;;  %v191_v20 = vsub.f32 %v187_v4, %v189_v57  ;;  %v195_v41 = vmul.f32 %v193_v13, %v185_v63  ;;  %v196_v42 = vmul.f32 %v194_v24, %v186_v6  ;;  %v357_v57 = vld [vmem:[%s880_s1 + $0x20] sm:$0xff] }
  0x27   :  { %v160_v28 = vmul.f32 %v386_v55, %v159_v21  ;;  %v192_v39 = vsub.f32 %v188_v12, %v190_v23  ;;  %v203_v43 = vmul.f32 %v685_v18, %v631_v38  ;;  %v205_v17 = vmul.f32 %v658_v22, %v623_v35 }
  0x28   :  { %v170_v31 = vmul.f32 %v388_v51, %v169_v29  ;;  %v204_v33 = vmul.f32 %v697_v25, %v639_v2  ;;  %v206_v50 = vmul.f32 %v688_v16, %v626_v53  ;;  %v209_v44 = vmul.f32 %v685_v18, %v623_v35 }
  0x29   :  { %v164_v46 = vsel %vm163_vm13, %v386_v55, %v160_v28  ;;  %v210_v1 = vmul.f32 %v697_v25, %v626_v53  ;;  %v199_v15 = vmul.f32 %v197_v30, %v191_v20  ;;  %v200_v10 = vmul.f32 %v198_v9, %v192_v39  ;;  %v359_v28 = vld [vmem:[%s881_s2 + $0x20] sm:$0xff]  ;;  %v360_v39 = vld [vmem:[%s881_s2 + $0x28] sm:$0xff] }
  0x2a   :  { %v174_v52 = vsel %vm173_vm14, %v388_v51, %v170_v31  ;;  %v175_v45 = vmul.f32 %v519_v32, %v164_v46  ;;  %v723_v0 = vmul.f32 %v543_v36, %v164_v46  ;;  %v207_v51 = vadd.f32 %v205_v17, %v203_v43  ;;  %v361_v46 = vld [vmem:[%s880_s1 + $0x30] sm:$0xff] }
  0x2b   :  { %v176_v55 = vmul.f32 %v531_v34, %v174_v52  ;;  %v729_v56 = vmul.f32 %v548_v37, %v174_v52  ;;  %v211_v32 = vmul.f32 %v658_v22, %v631_v38  ;;  %v212_v36 = vmul.f32 %v688_v16, %v639_v2  ;;  %v362_v52 = vld [vmem:[%s880_s1 + $0x38] sm:$0xff] }
  0x2c   :  { %v733_v26 = vsel %vm151_vm15, %v175_v45, 1.0  ;;  %vm892_vm6 = vcmp.gt.f32.partialorder %v576_v48, 0.0  ;;  %v208_v34 = vadd.f32 %v206_v50, %v204_v33  ;;  %v229_v47 = vmul.f32 %v723_v0, %v623_v35  ;;  %v363_v45 = vld [vmem:[%s881_s2 + $0x30] sm:$0xff] }
  0x2d   :  { %v741_v11 = vsel %vm892_vm6, %v176_v55, 1.0  ;;  %v227_v37 = vmul.f32 %v733_v26, %v631_v38  ;;  %v213_v54 = vsub.f32 %v209_v44, %v211_v32  ;;  %v214_v27 = vsub.f32 %v210_v1, %v212_v36  ;;  %v364_v1 = vld [vmem:[%s881_s2 + $0x38] sm:$0xff] }
  0x2e   :  { %v228_v40 = vmul.f32 %v741_v11, %v639_v2  ;;  %v230_v48 = vmul.f32 %v729_v56, %v626_v53  ;;  %v233_v61 = vmul.f32 %v733_v26, %v623_v35  ;;  %v234_v62 = vmul.f32 %v741_v11, %v626_v53  ;;  %v358_v53 = vld [vmem:[%s880_s1 + $0x28] sm:$0xff] }
  0x2f   :  { %v231_v60 = vadd.f32 %v229_v47, %v227_v37  ;;  %v235_v63 = vmul.f32 %v723_v0, %v631_v38  ;;  %v769_v4 = vadd.f32 %v199_v15, %v195_v41  ;;  %v771_v5 = vadd.f32 %v200_v10, %v196_v42 }
  0x30   :  { %v232_v6 = vadd.f32 %v230_v48, %v228_v40  ;;  %v236_v12 = vmul.f32 %v729_v56, %v639_v2  ;;  %v218_v13 = vmul.f32 %v353_v58, %v207_v51  ;;  %v253_v38 = vmul.f32 %v685_v18, %v643_v3 }
  0x31   :  { %v237_v35 = vsub.f32 %v233_v61, %v235_v63  ;;  %v254_v21 = vmul.f32 %v697_v25, %v650_v8  ;;  %v219_v23 = vmul.f32 %v354_v14, %v208_v34  ;;  %v223_v24 = vmul.f32 %v355_v19, %v213_v54  ;;  %v366_v61 = vld [vmem:[%s880_s1 + $0x48] sm:$0xff] }
  0x32   :  { %v224_v29 = vmul.f32 %v356_v59, %v214_v27  ;;  %v238_v2 = vsub.f32 %v234_v62, %v236_v12  ;;  %v242_v20 = vmul.f32 %v357_v57, %v231_v60  ;;  %v255_v41 = vmul.f32 %v658_v22, %v635_v49  ;;  %v365_v60 = vld [vmem:[%s880_s1 + $0x40] sm:$0xff]  ;;  %v368_v57 = vld [vmem:[%s881_s2 + $0x48] sm:$0xff] }
  0x33   :  { %v256_v31 = vmul.f32 %v688_v16, %v646_v7  ;;  %v259_v42 = vmul.f32 %v685_v18, %v635_v49  ;;  %v243_v30 = vmul.f32 %v358_v53, %v232_v6  ;;  %v260_v9 = vmul.f32 %v697_v25, %v646_v7 }
  0x34   :  { %v261_v43 = vmul.f32 %v658_v22, %v643_v3  ;;  %v262_v17 = vmul.f32 %v688_v16, %v650_v8  ;;  %v247_v33 = vmul.f32 %v359_v28, %v237_v35  ;;  %v257_v50 = vadd.f32 %v255_v41, %v253_v38 }
  0x35   :  { %v258_v44 = vadd.f32 %v256_v31, %v254_v21  ;;  %v279_v55 = vmul.f32 %v733_v26, %v643_v3  ;;  %v248_v15 = vmul.f32 %v360_v39, %v238_v2  ;;  %v280_v32 = vmul.f32 %v741_v11, %v650_v8  ;;  %v369_v31 = vld [vmem:[%s880_s1 + $0x50] sm:$0xff] }
  0x36   :  { %v263_v10 = vsub.f32 %v259_v42, %v261_v43  ;;  %v264_v51 = vsub.f32 %v260_v9, %v262_v17  ;;  %v225_v36 = vadd.f32 %v223_v24, %v218_v13  ;;  %v226_v34 = vadd.f32 %v224_v29, %v219_v23  ;;  %v370_v42 = vld [vmem:[%s880_s1 + $0x58] sm:$0xff] }
  0x37   :  { %v268_v37 = vmul.f32 %v361_v46, %v257_v50  ;;  %v281_v47 = vmul.f32 %v723_v0, %v635_v49  ;;  %v269_v54 = vmul.f32 %v362_v52, %v258_v44  ;;  %v282_v40 = vmul.f32 %v729_v56, %v646_v7 }
  0x38   :  { %v273_v27 = vmul.f32 %v363_v45, %v263_v10  ;;  %v274_v58 = vmul.f32 %v364_v1, %v264_v51  ;;  %v285_v14 = vmul.f32 %v733_v26, %v635_v49  ;;  %v286_v19 = vmul.f32 %v741_v11, %v646_v7  ;;  %v367_v7 = vld [vmem:[%s881_s2 + $0x40] sm:$0xff] }
  0x39   :  { %v283_v48 = vadd.f32 %v281_v47, %v279_v55  ;;  %v287_v59 = vmul.f32 %v723_v0, %v643_v3  ;;  %v249_v62 = vadd.f32 %v247_v33, %v242_v20  ;;  %v250_v63 = vadd.f32 %v248_v15, %v243_v30 }
  0x3a   :  { %v284_v6 = vadd.f32 %v282_v40, %v280_v32  ;;  %v288_v49 = vmul.f32 %v729_v56, %v650_v8  ;;  %v275_v12 = vadd.f32 %v273_v27, %v268_v37  ;;  %v305_v13 = vmul.f32 %v733_v26, %v685_v18 }
  0x3b   :  { %v289_v3 = vsub.f32 %v285_v14, %v287_v59  ;;  %v306_v35 = vmul.f32 %v741_v11, %v697_v25  ;;  %v276_v53 = vadd.f32 %v274_v58, %v269_v54  ;;  %v294_v21 = vmul.f32 %v365_v60, %v283_v48 }
  0x3c   :  { %v290_v38 = vsub.f32 %v286_v19, %v288_v49  ;;  %v295_v8 = vmul.f32 %v366_v61, %v284_v6  ;;  %v307_v24 = vmul.f32 %v723_v0, %v658_v22  ;;  %v308_v29 = vmul.f32 %v729_v56, %v688_v16 }
  0x3d   :  { %v299_v23 = vmul.f32 %v367_v7, %v289_v3  ;;  %v311_v2 = vmul.f32 %v733_v26, %v658_v22  ;;  %v312_v20 = vmul.f32 %v741_v11, %v688_v16  ;;  %v313_v39 = vmul.f32 %v723_v0, %v685_v18  ;;  %v371_v18 = vld [vmem:[%s881_s2 + $0x50] sm:$0xff] }
  0x3e   :  { %v300_v28 = vmul.f32 %v368_v57, %v290_v38  ;;  %v314_v41 = vmul.f32 %v729_v56, %v697_v25  ;;  %v251_v22 = vadd.f32 %v249_v62, %v769_v4  ;;  %v252_v26 = vadd.f32 %v250_v63, %v771_v5  ;;  %v372_v25 = vld [vmem:[%s881_s2 + $0x58] sm:$0xff] }
  0x3f   :  { %v309_v30 = vadd.f32 %v307_v24, %v305_v13  ;;  %v310_v16 = vadd.f32 %v308_v29, %v306_v35  ;;  %v301_v0 = vadd.f32 %v299_v23, %v294_v21  ;;  %v315_v11 = vsub.f32 %v311_v2, %v313_v39 }
  0x40   :  { %v302_v56 = vadd.f32 %v300_v28, %v295_v8  ;;  %v316_v9 = vsub.f32 %v312_v20, %v314_v41  ;;  %v277_v46 = vadd.f32 %v275_v12, %v225_v36  ;;  %v278_v4 = vadd.f32 %v276_v53, %v226_v34 }
  0x41   :  { %v320_v43 = vmul.f32 %v369_v31, %v309_v30  ;;  %v321_v17 = vmul.f32 %v370_v42, %v310_v16  ;;  %v325_v33 = vmul.f32 %v371_v18, %v315_v11  ;;  %v303_v50 = vadd.f32 %v301_v0, %v251_v22 }
  0x42   :  { %v326_v5 = vmul.f32 %v372_v25, %v316_v9  ;;  %v304_v44 = vadd.f32 %v302_v56, %v252_v26 }
  0x43   :  { %v327_v52 = vadd.f32 %v325_v33, %v320_v43 }
  0x44   :  { %v328_v45 = vadd.f32 %v326_v5, %v321_v17 }
  0x45   :  { %v329_v1 = vadd.f32 %v327_v52, %v277_v46 }
  0x46   :  { %v330_v55 = vadd.f32 %v328_v45, %v278_v4 }
  0x47   :  { %v331_v15 = vadd.f32 %v329_v1, %v303_v50 }
  0x48   :  { %v332_v10 = vadd.f32 %v330_v55, %v304_v44 }
  0x49   :  { %333 = vst [vmem:[%s882_s3] sm:$0xff] %v331_v15 }
  0x4a   :  { %334 = vst [vmem:[%s882_s3 + $0x8] sm:$0xff] %v332_v10 }

</bundles_post_ra>
